<compile_context>
chip_gen: v7x
topology: tpu7x:2x2x1
jax: 0.10.0
libtpu: 0.0.40
codegen_flags: <defaults>
</compile_context>

<pallas_src>
import jax
import jax.numpy as jnp
from jax.experimental import pallas as pl
from jax.experimental.pallas import tpu as pltpu

_LANE = 128      # last block dim: multiple of 128 lanes
_SUBLANE = 8     # second-to-last block dim: multiple of 8 sublanes
_MAX_TM = 1024   # rows per block; 1024*128*4B = 512 KiB per operand per buffer


def _identity_copy_kernel(x_ref, o_ref):
    # Pure pass-through: one VMEM tile in, same tile out.
    o_ref[...] = x_ref[...]


def pallas_identity(x):
    """Identity.forward(x) -> x, via a tiled Pallas copy kernel."""
    if x.size == 0:
        return x

    shape, dtype = x.shape, x.dtype
    flat = x.reshape(-1)
    n = flat.shape[0]

    # Lane-dense 2-D view: rows of 128 lanes, rows rounded up to a sublane
    # multiple so the (8, 128) block constraint always holds.
    rows = -(-n // _LANE)
    rows = -(-rows // _SUBLANE) * _SUBLANE

    # Bounded row tile; aim for >= 2 grid blocks so the "parallel" axis can be
    # split across v7x's two TensorCores (grid=(1,) wastes a core there).
    tm = max(_SUBLANE, min(_MAX_TM, (rows // 2) // _SUBLANE * _SUBLANE))
    rows_padded = -(-rows // tm) * tm
    grid = (rows_padded // tm,)

    pad = rows_padded * _LANE - n
    x2d = jnp.pad(flat, (0, pad)).reshape(rows_padded, _LANE)

    out = pl.pallas_call(
        _identity_copy_kernel,
        out_shape=jax.ShapeDtypeStruct((rows_padded, _LANE), dtype),
        grid=grid,
        in_specs=[pl.BlockSpec((tm, _LANE), lambda i: (i, 0))],
        out_specs=pl.BlockSpec((tm, _LANE), lambda i: (i, 0)),
        compiler_params=pltpu.CompilerParams(
            dimension_semantics=("parallel",)),
    )(x2d)

    # TODO(synk): with buffer donation, input_output_aliases={0: 0} would make
    # this a true zero-copy identity; kept as an explicit copy so the original
    # input stays live for comparison/testing.
    return out.reshape(-1)[:n].reshape(shape)


if __name__ == "__main__":
    key = jax.random.PRNGKey(0)
    # Small input consistent with the module (Identity accepts any tensor).
    x = jax.random.normal(key, (2, 4, 16, 16), dtype=jnp.float32)

    fwd = jax.jit(pallas_identity)
    y = jax.block_until_ready(fwd(x))

    assert y.shape == x.shape, (y.shape, x.shape)
    assert y.dtype == x.dtype, (y.dtype, x.dtype)
    assert bool(jnp.array_equal(y, x)), "identity output mismatch"
    print("KERNEL_OK")
</pallas_src>

<mosaic_0001>
module attributes {stable_mosaic.version = 11 : i64} {
  func.func @_identity_copy_kernel(%arg0: i32, %arg1: memref<8x128xf32, #tpu.memory_space<vmem>>, %arg2: memref<8x128xf32, #tpu.memory_space<vmem>>) attributes {dimension_semantics = [#tpu.dimension_semantics<parallel>], iteration_bounds = array<i64: 2>, scalar_prefetch = 0 : i64, scratch_operands = 0 : i64, tpu.core_type = #tpu.core_type<tc>, window_params = [{transform_indices = @transform_0, window_bounds = array<i64: 8, 128>}, {transform_indices = @transform_1, window_bounds = array<i64: 8, 128>}]} {
    %c0 = arith.constant 0 : index
    %c0_0 = arith.constant 0 : index
    %0 = vector.load %arg1[%c0, %c0_0] : memref<8x128xf32, #tpu.memory_space<vmem>>, vector<8x128xf32>
    %c0_1 = arith.constant 0 : index
    %c0_2 = arith.constant 0 : index
    %1 = vector.load %arg2[%c0_1, %c0_2] : memref<8x128xf32, #tpu.memory_space<vmem>>, vector<8x128xf32>
    tpu.vector_store %arg2[%c0_1, %c0_2], %0 {strides = array<i32>} : memref<8x128xf32, #tpu.memory_space<vmem>>, vector<8x128xf32>,
    return
  }
  func.func @transform_0(%arg0: i32) -> (i32, i32) {
    %c0_i32 = arith.constant 0 : i32
    %c0_i32_0 = arith.constant 0 : i32
    return %arg0, %c0_i32 : i32, i32
  }
  func.func @transform_1(%arg0: i32) -> (i32, i32) {
    %c0_i32 = arith.constant 0 : i32
    %c0_i32_0 = arith.constant 0 : i32
    return %arg0, %c0_i32 : i32, i32
  }
}

</mosaic_0001>

<bundles_post_ra>
// kernel: pallas_identity.1
= control target key start
LH: loop header
LB: loop body
LE: loop exit
PB: predicated region body
PF: predicated region fallthrough
CT: control target
= control target key end

     0   :  { %s188_s6 = smov 0   ;;  %s208_s0 = inlined_call_operand.vmem [shape: f32[16,128], index: 0, kind: input, shape index: {}]   ;;  %s209_s1 = inlined_call_operand.vmem [shape: f32[16,128], index: 1, kind: output, shape index: {}]  }
   0x1 LB: > { %s167_s7 = sadd.s32 4294967295, %s190_s6   ;;  %p171_p0 = scmp.ge.s32.totalorder %s190_s6, 1  ;;  %s190_s6 = sphi %s188_s6, %s11_s6  }
   0x2   : > { %p86_p1 = scmp.lt.s32.totalorder %s190_s6, 3 }
   0x4   : > { %p87_p2 = pnand %p171_p0, %p86_p1 }
   0x5   : > { %p104_p3 = scmp.lt.s32.totalorder (!%p87_p2), %s167_s7, 1 }
   0x6   : > { %90 = sbr.rel (%p87_p2) target bundleno = 18 (0x12), region = 24 }
   0xd   : > { %s211_s7 = smov (!%p104_p3, %s167_s7), 1 }
   0xe   : > { %s172_s8 = sshll.u32 %s211_s7, 3 }
   0xf   : > { %s107_s11 = scalar_lea.vmem %s208_s0, %s172_s8  ;;  %s111_s14 = scalar_lea.vmem %s209_s1, %s172_s8 }
  0x10   : > { %v112_v0 = vld [vmem:[%s107_s11] sm:$0xff] }
  0x11   : > { %113 = vst [vmem:[%s111_s14] sm:$0xff] %v112_v0 }
  0x12 PF: > { %s11_s6 = sadd.s32 1, %s190_s6  }
  0x13   : > { %p8_p4 = scmp.ge.s32.totalorder %s11_s6, 4  }
  0x15   :  { %10 = sbr.rel (!%p8_p4) target bundleno = 1 (0x1), region = 54 }

</bundles_post_ra>
